<compile_context>
chip_gen: v5e
topology: v5e:2x2
jax: 0.10.0
libtpu: 0.0.40
codegen_flags: <defaults>
</compile_context>

<pallas_src>
import jax
import jax.numpy as jnp
from jax import lax
from jax.experimental import pallas as pl
from jax.experimental.pallas import tpu as pltpu


def _round_up(n, m):
    return ((n + m - 1) // m) * m


def hyperproto_kernel(x_ref, w1_ref, b1_ref, w2_ref, b2_ref, protoT_ref,
                      out_ref, scores_ref):
    # ---- net(x): Linear -> ReLU -> Linear (f32 MXU accumulation) ------------
    x = x_ref[...]
    h = jnp.dot(x, w1_ref[...], preferred_element_type=jnp.float32) + b1_ref[...]
    h = jnp.maximum(h, 0.0)
    out = jnp.dot(h, w2_ref[...], preferred_element_type=jnp.float32) + b2_ref[...]
    out_ref[...] = out.astype(out_ref.dtype)

    # ---- predict: L2-normalize rows, then out_n @ proto.T -------------------
    # F.normalize(x, p=2, dim=1) = x / max(||x||_2, eps), eps = 1e-12.
    # rsqrt(max(sumsq, eps^2)) == 1 / max(||x||, eps)  -> one EUP op.
    eps = jnp.float32(1e-12)
    sumsq = jnp.sum(out * out, axis=1, keepdims=True)
    out_n = out * lax.rsqrt(jnp.maximum(sumsq, eps * eps))
    # proto is pre-transposed (E_pad, C_pad) on the host: contiguous MXU RHS.
    scores = jnp.dot(out_n, protoT_ref[...], preferred_element_type=jnp.float32)
    scores_ref[...] = scores.astype(scores_ref.dtype)


def hyperproto_forward_predict(x, w1, b1, w2, b2, proto, *, tb_max=256):
    B, D = x.shape
    H = w1.shape[1]
    E = w2.shape[1]
    C = proto.shape[0]

    # ---- lane-dense output padding (E, C -> multiples of 128) ---------------
    Ep = _round_up(E, 128)
    Cp = _round_up(C, 128)

    w2p = jnp.zeros((H, Ep), dtype=w2.dtype).at[:, :E].set(w2)
    b2p = jnp.zeros((1, Ep), dtype=b2.dtype).at[:, :E].set(b2)
    # Pre-transpose + pad prototypes: (C, E) -> (Ep, Cp). Padded rows/cols are
    # zero, so padded `out` columns contribute nothing and padded score columns
    # are exactly zero (sliced off below).
    protoT = jnp.zeros((Ep, Cp), dtype=proto.dtype).at[:E, :C].set(proto.T)

    # ---- batch tiling: large tiles, pad B instead of asserting divisibility -
    tb = min(tb_max, _round_up(B, 8))
    Bp = _round_up(B, tb)
    xp = x if Bp == B else jnp.zeros((Bp, D), dtype=x.dtype).at[:B, :].set(x)

    grid = (Bp // tb,)
    out_shapes = (
        jax.ShapeDtypeStruct((Bp, Ep), jnp.float32),  # forward() output (padded)
        jax.ShapeDtypeStruct((Bp, Cp), jnp.float32),  # predict() output (padded)
    )

    in_specs = [
        pl.BlockSpec((tb, D), lambda i: (i, 0)),    # x       (batch-tiled)
        pl.BlockSpec((D, H), lambda i: (0, 0)),     # W1      (grid-invariant)
        pl.BlockSpec((1, H), lambda i: (0, 0)),     # b1
        pl.BlockSpec((H, Ep), lambda i: (0, 0)),    # W2 (padded cols)
        pl.BlockSpec((1, Ep), lambda i: (0, 0)),    # b2 (padded cols)
        pl.BlockSpec((Ep, Cp), lambda i: (0, 0)),   # proto^T (padded)
    ]
    out_specs = (
        pl.BlockSpec((tb, Ep), lambda i: (i, 0)),
        pl.BlockSpec((tb, Cp), lambda i: (i, 0)),
    )

    out_p, scores_p = pl.pallas_call(
        hyperproto_kernel,
        out_shape=out_shapes,
        grid_spec=pltpu.PrefetchScalarGridSpec(
            num_scalar_prefetch=0,
            grid=grid,
            in_specs=in_specs,
            out_specs=out_specs,
        ),
        compiler_params=pltpu.CompilerParams(
            dimension_semantics=("parallel",),
            vmem_limit_bytes=64 * 1024 * 1024,
        ),
    )(xp, w1, b1, w2p, b2p, protoT)

    # Slice away batch / lane padding.
    return out_p[:B, :E], scores_p[:B, :C]


def reference(x, w1, b1, w2, b2, proto):
    h = jnp.maximum(x @ w1 + b1, 0.0)
    out = h @ w2 + b2
    norm = jnp.maximum(jnp.linalg.norm(out, axis=1, keepdims=True), 1e-12)
    scores = (out / norm) @ proto.T
    return out, scores


if __name__ == "__main__":
    # Small, deterministic shapes.
    B, D, H, E, C = 16, 32, 64, 32, 16

    key = jax.random.PRNGKey(0)
    kx, k1, k2, k3, k4, kp = jax.random.split(key, 6)

    x = jax.random.normal(kx, (B, D), dtype=jnp.float32)
    w1 = jax.random.normal(k1, (D, H), dtype=jnp.float32) * 0.1
    b1 = jax.random.normal(k2, (1, H), dtype=jnp.float32) * 0.01
    w2 = jax.random.normal(k3, (H, E), dtype=jnp.float32) * 0.1
    b2 = jax.random.normal(k4, (1, E), dtype=jnp.float32) * 0.01
    # Prototypes: one unit-norm vector per class (as HyperProto expects).
    proto = jax.random.normal(kp, (C, E), dtype=jnp.float32)
    proto = proto / jnp.linalg.norm(proto, axis=1, keepdims=True)

    out, scores = hyperproto_forward_predict(x, w1, b1, w2, b2, proto)
    jax.block_until_ready((out, scores))

    out_ref, scores_ref = reference(x, w1, b1, w2, b2, proto)
    assert jnp.allclose(out, out_ref, atol=1e-4, rtol=1e-4)
    assert jnp.allclose(scores, scores_ref, atol=1e-4, rtol=1e-4)

    # TODO(synk): optimize()/loss()/test() (training step, AMP, optimizer,
    # scheduler) are host-side training plumbing, not part of the forward kernel.
    print("KERNEL_OK")
</pallas_src>

<mosaic_0001>
module attributes {stable_mosaic.version = 11 : i64} {
  func.func @hyperproto_kernel(%arg0: i32, %arg1: memref<16x32xf32, #tpu.memory_space<vmem>>, %arg2: memref<32x64xf32, #tpu.memory_space<vmem>>, %arg3: memref<1x64xf32, #tpu.memory_space<vmem>>, %arg4: memref<64x128xf32, #tpu.memory_space<vmem>>, %arg5: memref<1x128xf32, #tpu.memory_space<vmem>>, %arg6: memref<128x128xf32, #tpu.memory_space<vmem>>, %arg7: memref<16x128xf32, #tpu.memory_space<vmem>>, %arg8: memref<16x128xf32, #tpu.memory_space<vmem>>) attributes {dimension_semantics = [#tpu.dimension_semantics<parallel>], iteration_bounds = array<i64: 1>, scalar_prefetch = 0 : i64, scratch_operands = 0 : i64, tpu.core_type = #tpu.core_type<tc>, window_params = [{transform_indices = @transform_0, window_bounds = array<i64: 16, 32>}, {pipeline_mode = #tpu.pipeline_mode<synchronous>, transform_indices = @transform_1, window_bounds = array<i64: 32, 64>}, {pipeline_mode = #tpu.pipeline_mode<synchronous>, transform_indices = @transform_2, window_bounds = array<i64: 1, 64>}, {pipeline_mode = #tpu.pipeline_mode<synchronous>, transform_indices = @transform_3, window_bounds = array<i64: 64, 128>}, {pipeline_mode = #tpu.pipeline_mode<synchronous>, transform_indices = @transform_4, window_bounds = array<i64: 1, 128>}, {pipeline_mode = #tpu.pipeline_mode<synchronous>, transform_indices = @transform_5, window_bounds = array<i64: 128, 128>}, {transform_indices = @transform_6, window_bounds = array<i64: 16, 128>}, {transform_indices = @transform_7, window_bounds = array<i64: 16, 128>}]} {
    %c0 = arith.constant 0 : index
    %c0_0 = arith.constant 0 : index
    %0 = vector.load %arg1[%c0, %c0_0] : memref<16x32xf32, #tpu.memory_space<vmem>>, vector<16x32xf32>
    %c0_1 = arith.constant 0 : index
    %c0_2 = arith.constant 0 : index
    %1 = vector.load %arg2[%c0_1, %c0_2] : memref<32x64xf32, #tpu.memory_space<vmem>>, vector<32x64xf32>
    %cst = arith.constant dense<0.000000e+00> : vector<16x64xf32>
    %2 = tpu.matmul %0, %1, %cst {dimension_numbers = #tpu.dot_dimension_numbers<[1], [0], [0], [1], [0, 0, 1, 1], [], []>} : vector<16x32xf32>, vector<32x64xf32>, vector<16x64xf32> -> vector<16x64xf32>
    %c0_3 = arith.constant 0 : index
    %c0_4 = arith.constant 0 : index
    %3 = vector.load %arg3[%c0_3, %c0_4] : memref<1x64xf32, #tpu.memory_space<vmem>>, vector<1x64xf32>
    %4 = vector.broadcast %3 : vector<1x64xf32> to vector<16x64xf32>
    %5 = arith.addf %2, %4 : vector<16x64xf32>
    %cst_5 = arith.constant 0.000000e+00 : f32
    %6 = vector.broadcast %cst_5 : f32 to vector<16x64xf32>
    %7 = arith.maximumf %5, %6 : vector<16x64xf32>
    %c0_6 = arith.constant 0 : index
    %c0_7 = arith.constant 0 : index
    %8 = vector.load %arg4[%c0_6, %c0_7] : memref<64x128xf32, #tpu.memory_space<vmem>>, vector<64x128xf32>
    %cst_8 = arith.constant dense<0.000000e+00> : vector<16x128xf32>
    %9 = tpu.matmul %7, %8, %cst_8 {dimension_numbers = #tpu.dot_dimension_numbers<[1], [0], [0], [1], [0, 0, 1, 1], [], []>} : vector<16x64xf32>, vector<64x128xf32>, vector<16x128xf32> -> vector<16x128xf32>
    %c0_9 = arith.constant 0 : index
    %c0_10 = arith.constant 0 : index
    %10 = vector.load %arg5[%c0_9, %c0_10] : memref<1x128xf32, #tpu.memory_space<vmem>>, vector<1x128xf32>
    %11 = vector.broadcast %10 : vector<1x128xf32> to vector<16x128xf32>
    %12 = arith.addf %9, %11 : vector<16x128xf32>
    %c0_11 = arith.constant 0 : index
    %c0_12 = arith.constant 0 : index
    %13 = vector.load %arg7[%c0_11, %c0_12] : memref<16x128xf32, #tpu.memory_space<vmem>>, vector<16x128xf32>
    tpu.vector_store %arg7[%c0_11, %c0_12], %12 {strides = array<i32>} : memref<16x128xf32, #tpu.memory_space<vmem>>, vector<16x128xf32>,
    %14 = arith.mulf %12, %12 : vector<16x128xf32>
    %cst_13 = arith.constant dense<0.000000e+00> : vector<16xf32>
    %15 = vector.multi_reduction <add>, %14, %cst_13 [1] : vector<16x128xf32> to vector<16xf32>
    %16 = vector.shape_cast %15 : vector<16xf32> to vector<16x1xf32>
    %cst_14 = arith.constant 9.99999996E-13 : f32
    %cst_15 = arith.constant 9.99999996E-13 : f32
    %17 = arith.mulf %cst_14, %cst_15 : f32
    %18 = vector.broadcast %17 : f32 to vector<16x1xf32>
    %19 = arith.maximumf %16, %18 : vector<16x1xf32>
    %20 = math.rsqrt %19 : vector<16x1xf32>
    %21 = vector.broadcast %20 : vector<16x1xf32> to vector<16x128xf32>
    %22 = arith.mulf %12, %21 : vector<16x128xf32>
    %c0_16 = arith.constant 0 : index
    %c0_17 = arith.constant 0 : index
    %23 = vector.load %arg6[%c0_16, %c0_17] : memref<128x128xf32, #tpu.memory_space<vmem>>, vector<128x128xf32>
    %cst_18 = arith.constant dense<0.000000e+00> : vector<16x128xf32>
    %24 = tpu.matmul %22, %23, %cst_18 {dimension_numbers = #tpu.dot_dimension_numbers<[1], [0], [0], [1], [0, 0, 1, 1], [], []>} : vector<16x128xf32>, vector<128x128xf32>, vector<16x128xf32> -> vector<16x128xf32>
    %c0_19 = arith.constant 0 : index
    %c0_20 = arith.constant 0 : index
    %25 = vector.load %arg8[%c0_19, %c0_20] : memref<16x128xf32, #tpu.memory_space<vmem>>, vector<16x128xf32>
    tpu.vector_store %arg8[%c0_19, %c0_20], %24 {strides = array<i32>} : memref<16x128xf32, #tpu.memory_space<vmem>>, vector<16x128xf32>,
    return
  }
  func.func @transform_0(%arg0: i32) -> (i32, i32) {
    %c0_i32 = arith.constant 0 : i32
    %c0_i32_0 = arith.constant 0 : i32
    return %arg0, %c0_i32 : i32, i32
  }
  func.func @transform_1(%arg0: i32) -> (i32, i32) {
    %c0_i32 = arith.constant 0 : i32
    %c0_i32_0 = arith.constant 0 : i32
    %c0_i32_1 = arith.constant 0 : i32
    return %c0_i32, %c0_i32_0 : i32, i32
  }
  func.func @transform_2(%arg0: i32) -> (i32, i32) {
    %c0_i32 = arith.constant 0 : i32
    %c0_i32_0 = arith.constant 0 : i32
    %c0_i32_1 = arith.constant 0 : i32
    return %c0_i32, %c0_i32_0 : i32, i32
  }
  func.func @transform_3(%arg0: i32) -> (i32, i32) {
    %c0_i32 = arith.constant 0 : i32
    %c0_i32_0 = arith.constant 0 : i32
    %c0_i32_1 = arith.constant 0 : i32
    return %c0_i32, %c0_i32_0 : i32, i32
  }
  func.func @transform_4(%arg0: i32) -> (i32, i32) {
    %c0_i32 = arith.constant 0 : i32
    %c0_i32_0 = arith.constant 0 : i32
    %c0_i32_1 = arith.constant 0 : i32
    return %c0_i32, %c0_i32_0 : i32, i32
  }
  func.func @transform_5(%arg0: i32) -> (i32, i32) {
    %c0_i32 = arith.constant 0 : i32
    %c0_i32_0 = arith.constant 0 : i32
    %c0_i32_1 = arith.constant 0 : i32
    return %c0_i32, %c0_i32_0 : i32, i32
  }
  func.func @transform_6(%arg0: i32) -> (i32, i32) {
    %c0_i32 = arith.constant 0 : i32
    %c0_i32_0 = arith.constant 0 : i32
    return %arg0, %c0_i32 : i32, i32
  }
  func.func @transform_7(%arg0: i32) -> (i32, i32) {
    %c0_i32 = arith.constant 0 : i32
    %c0_i32_0 = arith.constant 0 : i32
    return %arg0, %c0_i32 : i32, i32
  }
}

</mosaic_0001>

<bundles_post_ra>
// kernel: tpu_custom_call.1
= control target key start
LH: loop header
LB: loop body
LE: loop exit
PB: predicated region body
PF: predicated region fallthrough
CT: control target
= control target key end

     0   :  { %13 = vsyncpa [#allocation3], 0  ;;  %s570_s0 = inlined_call_operand.hbm [shape: f32[16,32], index: 0, kind: input, shape index: {}]   ;;  %s571_s1 = inlined_call_operand.hbm [shape: f32[32,64], index: 1, kind: input, shape index: {}]   ;;  %s572_s2 = inlined_call_operand.vmem [shape: f32[1,64], index: 2, kind: input, shape index: {}]   ;;  %s573_s3 = inlined_call_operand.hbm [shape: f32[64,128], index: 3, kind: input, shape index: {}]   ;;  %s574_s4 = inlined_call_operand.vmem [shape: f32[1,128], index: 4, kind: input, shape index: {}]   ;;  %s575_s5 = inlined_call_operand.hbm [shape: f32[128,128], index: 5, kind: input, shape index: {}]   ;;  %s576_s6 = inlined_call_operand.hbm [shape: f32[16,128], index: 6, kind: output, shape index: {0}]   ;;  %s577_s7 = inlined_call_operand.hbm [shape: f32[16,128], index: 7, kind: output, shape index: {1}]  }
   0x1   :  { %14 = vsyncpa [#allocation6], 0 }
   0x2   :  { %15 = vsyncpa [#allocation9], 0 }
   0x3   :  { %16 = vsyncpa [#allocation4], 0 }
   0x4   :  { %17 = vsyncpa [#allocation12], 0  ;;  %s35_s26 = sshll.u32 %s571_s1, 4  ;;  %s474_s27 = smov [#allocation5]   ;;  %s36_s26 = int_to_ptr.hbm [resolvable:$true] %s35_s26 }
   0x5   :  { %s37_s28 = sshll.u32 %s474_s27, 4  ;;  %s22_s8 = sshll.u32 %s570_s0, 4  ;;  %s38_s28 = int_to_ptr.vmem [resolvable:$true] %s37_s28  ;;  %s23_s8 = int_to_ptr.hbm [resolvable:$true] %s22_s8 }
   0x6   :  { %s475_s9 = smov 128   ;;  %s476_s10 = smov 8  }
   0x7   :  { %43 = dma.hbm_to_vmem [thread:$0]  %s36_s26, 512, %s38_s28, [#allocation6], %s475_s9, %s475_s9, %s476_s10  }
   0x8   :  { %s477_s11 = smov [#allocation2]   ;;  %s50_s1 = sshll.u32 %s573_s3, 4  ;;  %s51_s1 = int_to_ptr.hbm [resolvable:$true] %s50_s1 }
   0x9   :  { %s24_s12 = sshll.u32 %s477_s11, 4  ;;  %s65_s16 = sshll.u32 %s575_s5, 4  ;;  %s25_s12 = int_to_ptr.vmem [resolvable:$true] %s24_s12  ;;  %s66_s16 = int_to_ptr.hbm [resolvable:$true] %s65_s16 }
   0xa   :  { %30 = dma.hbm_to_vmem [thread:$0]  %s23_s8, 256, %s25_s12, [#allocation3], %s475_s9, %s475_s9, %s476_s10  }
   0xb   :  { %s478_s17 = smov [#allocation7]   ;;  %s479_s19 = smov [#allocation8]  }
   0xc   :  { %s52_s18 = sshll.u32 %s478_s17, 4  ;;  %s67_s3 = sshll.u32 %s479_s19, 4  ;;  %s53_s18 = int_to_ptr.vmem [resolvable:$true] %s52_s18  ;;  %s68_s3 = int_to_ptr.vmem [resolvable:$true] %s67_s3 }
   0xd   :  { %58 = dma.hbm_to_vmem [thread:$0]  %s51_s1, 1024, %s53_s18, [#allocation6], %s475_s9, %s475_s9, %s476_s10  }
   0xe   :  { %73 = dma.hbm_to_vmem [thread:$0]  %s66_s16, 2048, %s68_s3, [#allocation9], %s475_s9, %s475_s9, %s476_s10  }
   0xf   :  { %464 = dma.done.wait [#allocation3], 256  }
  0x10   :  { %465 = vsyncadd [#allocation3], 4294967040 }
  0x11   :  { %466 = dma.done.wait [#allocation6], 1536  }
  0x12   :  { %467 = vsyncadd [#allocation6], 4294965760 }
  0x13   :  { %468 = dma.done.wait [#allocation9], 2048  }
  0x14   :  { %469 = vsyncadd [#allocation9], 4294965248  ;;  %v95_v0 = vld [vmem:[#allocation5 + $0x18] sm:$0xff]  ;;  %v94_v1 = vld [vmem:[#allocation5 + $0x10] sm:$0xff]  ;;  %vm100_vm0 = vcmask 261120   ;;  %vm144_vm1 = vcmask 523264  }
  0x15   :  { %119 = vmatpush.msra.mxu0 %v95_v0  ;;  %v93_v2 = vld [vmem:[#allocation5 + $0x8] sm:$0xff]  ;;  %v139_v3 = vld [vmem:[#allocation7 + $0x38] sm:$0xff]  ;;  %v138_v4 = vld [vmem:[#allocation7 + $0x30] sm:$0xff]  ;;  %s253_s25 = sshll.u32 %s576_s6, 4  ;;  %s481_s26 = smov [#allocation11]   ;;  %s254_s25 = int_to_ptr.hbm [resolvable:$true] %s253_s25 }
  0x16   :  { %159 = vmatpush.msra.mxu1 %v139_v3  ;;  %v92_v5 = vld [vmem:[#allocation5] sm:$0xff]  ;;  %v137_v6 = vld [vmem:[#allocation7 + $0x28] sm:$0xff]  ;;  %v90_v7 = vld [vmem:[#allocation2] sm:$0xff]  ;;  %s264_s27 = sshll.u32 %s481_s26, 4  ;;  %s266_s30 = sshll.u32 %s577_s7, 4  ;;  %s265_s27 = int_to_ptr.vmem [resolvable:$true] %s264_s27  ;;  %s267_s30 = int_to_ptr.hbm [resolvable:$true] %s266_s30 }
  0x17   :  { %120 = vmatpush.msra.mxu0 %v94_v1  ;;  %v136_v8 = vld [vmem:[#allocation7 + $0x20] sm:$0xff]  ;;  %v135_v9 = vld [vmem:[#allocation7 + $0x18] sm:$0xff]  ;;  %v134_v11 = vld [vmem:[#allocation7 + $0x10] sm:$0xff] }
  0x18   :  { %160 = vmatpush.msra.mxu1 %v138_v4  ;;  %v91_v10 = vld [vmem:[#allocation2 + $0x8] sm:$0xff]  ;;  %v133_v12 = vld [vmem:[#allocation7 + $0x8] sm:$0xff]  ;;  %v132_v13 = vld [vmem:[#allocation7] sm:$0xff] }
  0x19   :  { %121 = vmatpush.msra.mxu0 %v93_v2  ;;  %v314_v14 = vld [vmem:[%s572_s2] ss:$0 sm:$0xff]  ;;  %v221_v21 = vld [vmem:[#allocation8 + $0x78] sm:$0xff]  ;;  %v219_v23 = vld [vmem:[#allocation8 + $0x68] sm:$0xff] }
  0x1a   :  { %161 = vmatpush.msra.mxu1 %v137_v6  ;;  %v220_v22 = vld [vmem:[#allocation8 + $0x70] sm:$0xff]  ;;  %222 = vmatpush.msra.mxu2 %v221_v21  ;;  %v218_v24 = vld [vmem:[#allocation8 + $0x60] sm:$0xff]  ;;  %v217_v25 = vld [vmem:[#allocation8 + $0x58] sm:$0xff] }
  0x1b   :  { %122 = vmatpush.msra.mxu0 %v92_v5  ;;  %290 = vmatpush.msra.mxu3 %v221_v21  ;;  %v315_v26 = vld [vmem:[%s574_s4] ss:$0 sm:$0xff]  ;;  %v215_v34 = vld [vmem:[#allocation8 + $0x48] sm:$0xff]  ;;  %v214_v35 = vld [vmem:[#allocation8 + $0x40] sm:$0xff]  ;;  %s480_s4 = smov [#allocation10]  }
  0x1c   :  { %286 = vmatmul.msk.f32.vlgmr.msra.gmra.mxu0 %vm100_vm0, %v90_v7  ;;  %162 = vmatpush.msra.mxu1 %v136_v8  ;;  %v216_v33 = vld [vmem:[#allocation8 + $0x50] sm:$0xff]  ;;  %v213_v36 = vld [vmem:[#allocation8 + $0x38] sm:$0xff]  ;;  %v211_v38 = vld [vmem:[#allocation8 + $0x28] sm:$0xff]  ;;  %s251_s22 = sshll.u32 %s480_s4, 4  ;;  %s252_s22 = int_to_ptr.vmem [resolvable:$true] %s251_s22 }
  0x1d   :  { %223 = vmatpush.msra.mxu2 %v220_v22  ;;  %291 = vmatpush.msra.mxu3 %v220_v22  ;;  %v212_v37 = vld [vmem:[#allocation8 + $0x30] sm:$0xff]  ;;  %v210_v39 = vld [vmem:[#allocation8 + $0x20] sm:$0xff]  ;;  %v209_v40 = vld [vmem:[#allocation8 + $0x18] sm:$0xff] }
  0x1e   :  { %163 = vmatpush.msra.mxu1 %v135_v9  ;;  %v208_v41 = vld [vmem:[#allocation8 + $0x10] sm:$0xff]  ;;  %v207_v42 = vld [vmem:[#allocation8 + $0x8] sm:$0xff]  ;;  %v206_v43 = vld [vmem:[#allocation8] sm:$0xff] }
  0x1f   :  { %224 = vmatpush.msra.mxu2 %v219_v23  ;;  %292 = vmatpush.msra.mxu3 %v219_v23 }
  0x20   :  { %164 = vmatpush.msra.mxu1 %v134_v11 }
  0x21   :  { %225 = vmatpush.msra.mxu2 %v218_v24  ;;  %293 = vmatpush.msra.mxu3 %v218_v24 }
  0x22   :  { %165 = vmatpush.msra.mxu1 %v133_v12 }
  0x23   :  { %226 = vmatpush.msra.mxu2 %v217_v25  ;;  %294 = vmatpush.msra.mxu3 %v217_v25 }
  0x24   :  { %287 = vmatmul.msk.f32.gmra.mxu0 %vm100_vm0, %v91_v10  ;;  %166 = vmatpush.msra.mxu1 %v132_v13 }
  0x25   :  { %227 = vmatpush.msra.mxu2 %v216_v33  ;;  %295 = vmatpush.msra.mxu3 %v216_v33 }
  0x27   :  { %228 = vmatpush.msra.mxu2 %v215_v34  ;;  %296 = vmatpush.msra.mxu3 %v215_v34 }
  0x29   :  { %229 = vmatpush.msra.mxu2 %v214_v35  ;;  %297 = vmatpush.msra.mxu3 %v214_v35 }
  0x2b   :  { %230 = vmatpush.msra.mxu2 %v213_v36  ;;  %298 = vmatpush.msra.mxu3 %v213_v36 }
  0x2d   :  { %231 = vmatpush.msra.mxu2 %v212_v37  ;;  %299 = vmatpush.msra.mxu3 %v212_v37 }
  0x2f   :  { %232 = vmatpush.msra.mxu2 %v211_v38  ;;  %300 = vmatpush.msra.mxu3 %v211_v38 }
  0x31   :  { %233 = vmatpush.msra.mxu2 %v210_v39  ;;  %301 = vmatpush.msra.mxu3 %v210_v39 }
  0x33   :  { %234 = vmatpush.msra.mxu2 %v209_v40  ;;  %302 = vmatpush.msra.mxu3 %v209_v40 }
  0x35   :  { %235 = vmatpush.msra.mxu2 %v208_v41  ;;  %303 = vmatpush.msra.mxu3 %v208_v41 }
  0x37   :  { %236 = vmatpush.msra.mxu2 %v207_v42  ;;  %304 = vmatpush.msra.mxu3 %v207_v42 }
  0x39   :  { %237 = vmatpush.msra.mxu2 %v206_v43  ;;  %305 = vmatpush.msra.mxu3 %v206_v43 }
  0x99   :  { %v124_v15 = vpop.f32.mrf.mxu0 }
  0x9a   :  { %v125_v16 = vadd.f32 %v314_v14, %v124_v15 }
  0x9c   :  { %v130_v17 = vmax.f32 %v125_v16, 0.0 }
  0x9e   :  { %288 = vmatmul.msk.f32.vlgmr.msra.gmra.mxu1 %vm144_vm1, %v130_v17 }
  0xa1   :  { %v127_v18 = vpop.f32.mrf.mxu0 }
  0xa2   :  { %v128_v19 = vadd.f32 %v314_v14, %v127_v18 }
  0xa4   :  { %v131_v20 = vmax.f32 %v128_v19, 0.0 }
  0xa6   :  { %289 = vmatmul.msk.f32.gmra.mxu1 %vm144_vm1, %v131_v20 }
 0x11b   :  { %v168_v27 = vpop.f32.mrf.mxu1 }
 0x11c   :  { %v169_v28 = vadd.f32 %v315_v26, %v168_v27 }
 0x11e   :  { %174 = vst [vmem:[#allocation10] sm:$0xff] %v169_v28  ;;  %v176_v29 = vmul.f32 %v169_v28, %v169_v28 }
 0x120   :  { %178 = vadd.xlane.f32.xlu0 %v176_v29 }
 0x123   :  { %v171_v30 = vpop.f32.mrf.mxu1 }
 0x124   :  { %v552_v31 = vadd.f32 %v315_v26, %v171_v30 }
 0x126   :  { %175 = vst [vmem:[#allocation10 + $0x8] sm:$0xff] %v552_v31  ;;  %v177_v32 = vmul.f32 %v552_v31, %v552_v31 }
 0x127   :  { %259 = dma.vmem_to_hbm [thread:$0]  %s252_s22, 256, %s254_s25, [#allocation4], %s475_s9, %s475_s9, %s476_s10  }
 0x128   :  { %180 = vadd.xlane.f32.xlu0 %v177_v32 }
 0x193   :  { %v179_v44 = vpop.xlane.xlu0 %178 }
 0x194   :  { %v182_v45 = vmax.f32 %v179_v44, 1e-24 }
 0x196   :  { %316 = vrsqrt.f32 %v182_v45  ;;  %vm190_vm3 = vweird.f32 %v182_v45 }
 0x19b   :  { %v181_v46 = vpop.xlane.xlu0 %180 }
 0x19c   :  { %v317_v47 = vpop.eup %316  ;;  %v183_v48 = vmax.f32 %v181_v46, 1e-24 }
 0x19d   :  { %v185_v49 = vmul.f32 %v317_v47, %v182_v45  ;;  %vm191_vm2 = vweird.f32 %v317_v47 }
 0x19e   :  { %318 = vrsqrt.f32 %v183_v48  ;;  %vm192_vm4 = vmor %vm190_vm3, %vm191_vm2  ;;  %vm200_vm6 = vweird.f32 %v183_v48 }
 0x19f   :  { %v186_v50 = vmul.f32 %v317_v47, %v185_v49 }
 0x1a1   :  { %v187_v51 = vmul.f32 0.5, %v186_v50 }
 0x1a3   :  { %v188_v52 = vsub.f32 1.5, %v187_v51 }
 0x1a4   :  { %v319_v53 = vpop.eup %318 }
 0x1a5   :  { %v195_v54 = vmul.f32 %v319_v53, %v183_v48  ;;  %v189_v55 = vmul.f32 %v317_v47, %v188_v52  ;;  %vm201_vm5 = vweird.f32 %v319_v53 }
 0x1a6   :  { %vm202_vm7 = vmor %vm200_vm6, %vm201_vm5 }
 0x1a7   :  { %v196_v56 = vmul.f32 %v319_v53, %v195_v54  ;;  %v193_v57 = vsel %vm192_vm4, %v317_v47, %v189_v55 }
 0x1a8   :  { %v204_v58 = vmul.f32 %v193_v57, %v169_v28 }
 0x1a9   :  { %v197_v59 = vmul.f32 0.5, %v196_v56 }
 0x1aa   :  { %238 = vmatmul.f32.vlgmr.msra.gmra.mxu2 %v204_v58 }
 0x1ab   :  { %v198_v60 = vsub.f32 1.5, %v197_v59 }
 0x1ad   :  { %v199_v61 = vmul.f32 %v319_v53, %v198_v60 }
 0x1af   :  { %v203_v62 = vsel %vm202_vm7, %v319_v53, %v199_v61 }
 0x1b0   :  { %v205_v63 = vmul.f32 %v203_v62, %v552_v31 }
 0x1b2   :  { %241 = vmatmul.f32.vlgmr.msra.gmra.mxu3 %v205_v63 }
 0x22d   :  { %v239_v0 = vpop.f32.mrf.mxu2 }
 0x22e   :  { %245 = vst [vmem:[#allocation11] sm:$0xff] %v239_v0 }
 0x235   :  { %v242_v1 = vpop.f32.mrf.mxu3 }
 0x236   :  { %246 = vst [vmem:[#allocation11 + $0x8] sm:$0xff] %v242_v1 }
 0x237   :  { %272 = dma.vmem_to_hbm [thread:$0]  %s265_s27, 256, %s267_s30, [#allocation12], %s475_s9, %s475_s9, %s476_s10  }
 0x238   :  { %470 = dma.done.wait [#allocation4], 256  }
 0x239   :  { %471 = vsyncadd [#allocation4], 4294967040 }
 0x23a   :  { %472 = dma.done.wait [#allocation12], 256  }
 0x23b   :  { %473 = vsyncadd [#allocation12], 4294967040 }
 0x23c   :  { %281 = vsyncpa [#allocation3], 1 }
 0x23d   :  { %282 = vsyncpa [#allocation6], 1 }
 0x23e   :  { %283 = vsyncpa [#allocation9], 1 }
 0x23f   :  { %284 = vsyncpa [#allocation4], 1 }
 0x240   :  { %285 = vsyncpa [#allocation12], 1 }

</bundles_post_ra>
